<compile_context>
chip_gen: v7x
topology: tpu7x:2x2x1
jax: 0.10.0
libtpu: 0.0.40
codegen_flags: <defaults>
</compile_context>

<pallas_src>
import functools

import numpy as np
import jax
import jax.numpy as jnp
from jax.experimental import pallas as pl
from jax.experimental.pallas import tpu as pltpu

CHANS = [4, 8, 8, 8]
# (C_in, C_out, stride, pad) for each 3x3 conv, input spatial 10x10
CONV_CFG = [(1, CHANS[0], 1, 1),
            (CHANS[0], CHANS[1], 2, 0),
            (CHANS[1], CHANS[2], 2, 1),
            (CHANS[2], CHANS[3], 2, 1)]
IN_FEAT = 100          # 1 * 10 * 10 flattened input features per sample (C,H,W order)
OUT_F = CHANS[-1]      # 8 real output features (conv4 output is 8 x 1 x 1)


def _round_up(n, m):
    return (n + m - 1) // m * m


# ---------------------------------------------------------------------------
# Parameter init (deterministic, PyTorch-default-style uniform bounds)
# ---------------------------------------------------------------------------
def build_params(key):
    ws, bs = [], []
    for (cin, cout, _, _) in CONV_CFG:
        key, k1, k2 = jax.random.split(key, 3)
        fan_in = cin * 9
        bound = 1.0 / np.sqrt(fan_in)
        W = jax.random.uniform(k1, (cout, cin, 3, 3), jnp.float32, -bound, bound)
        B = jax.random.uniform(k2, (cout,), jnp.float32, -bound, bound)
        ws.append(W)
        bs.append(B)
    return ws, bs


# ---------------------------------------------------------------------------
# Lower each Conv2d on the fixed grid to a dense matrix + bias, then fuse the
# whole chain into one (100, 8) operator + (1, 8) bias (exact: chain is affine).
# ---------------------------------------------------------------------------
def _conv_as_matrix(W, B, cin, cout, s, p, h_in, w_in):
    h_out = (h_in + 2 * p - 3) // s + 1
    w_out = (w_in + 2 * p - 3) // s + 1
    M = np.zeros((cin * h_in * w_in, cout * h_out * w_out), np.float64)
    bv = np.zeros((cout * h_out * w_out,), np.float64)
    for co in range(cout):
        for oh in range(h_out):
            for ow in range(w_out):
                j = (co * h_out + oh) * w_out + ow
                bv[j] = B[co]
                for ci in range(cin):
                    for kh in range(3):
                        for kw in range(3):
                            hi = oh * s + kh - p
                            wi = ow * s + kw - p
                            if 0 <= hi < h_in and 0 <= wi < w_in:
                                ii = (ci * h_in + hi) * w_in + wi
                                M[ii, j] += W[co, ci, kh, kw]
    return M, bv, h_out, w_out


def build_fused_operator(ws, bs):
    h, w = 10, 10
    m_fused, b_fused = None, None
    for (cin, cout, s, p), W, B in zip(CONV_CFG, ws, bs):
        M, bv, h, w = _conv_as_matrix(np.asarray(W, np.float64),
                                      np.asarray(B, np.float64),
                                      cin, cout, s, p, h, w)
        if m_fused is None:
            m_fused, b_fused = M, bv
        else:
            b_fused = b_fused @ M + bv
            m_fused = m_fused @ M
    # m_fused: (100, 8), b_fused: (8,) -- keep them narrow (no lane padding).
    m_op = jnp.asarray(m_fused.astype(np.float32))              # (100, 8)
    b_op = jnp.asarray(b_fused.astype(np.float32)[None, :])     # (1, 8)
    return m_op, b_op


# ---------------------------------------------------------------------------
# Pallas kernel: one fused MXU matmul + one broadcast bias add per tile.
# ---------------------------------------------------------------------------
def gridconv_kernel(x_ref, m_ref, b_ref, o_ref, *, precision):
    y = jnp.dot(x_ref[...], m_ref[...],
                preferred_element_type=jnp.float32,
                precision=precision)
    o_ref[...] = (y + b_ref[...]).astype(o_ref.dtype)


def gridconv_forward(x, m_fused, b_fused, *, tile_n=2048,
                     precision=jax.lax.Precision.HIGHEST):
    # x: (B, T, 10, 10) float32  ->  (B, T, CHANS[-1])
    batch, time_dim = x.shape[0], x.shape[1]
    n = batch * time_dim

    # Large tiles for big B*T (amortize ~0.35us/step); shrink for small inputs
    # so we still get >= 2 grid steps (v7x megacore). Always a multiple of 8.
    tile_n = max(8, min(tile_n, _round_up(pl.cdiv(n, 2), 8)))
    grid_n = pl.cdiv(n, tile_n)

    # Free view (contiguous reshape), (C=1,H,W) flattening matches operator rows.
    x_flat = x.reshape(n, IN_FEAT).astype(jnp.float32)

    kernel = functools.partial(gridconv_kernel, precision=precision)
    out = pl.pallas_call(
        kernel,
        out_shape=jax.ShapeDtypeStruct((n, OUT_F), jnp.float32),
        grid_spec=pltpu.PrefetchScalarGridSpec(
            num_scalar_prefetch=0,
            grid=(grid_n,),
            in_specs=[
                # per-tile samples; last dim == full array dim (100) is legal
                pl.BlockSpec((tile_n, IN_FEAT), lambda i: (i, 0)),
                # fused operator, resident across the whole grid
                pl.BlockSpec((IN_FEAT, OUT_F), lambda i: (0, 0)),
                # fused bias, resident
                pl.BlockSpec((1, OUT_F), lambda i: (0, 0)),
            ],
            # narrow output: only the 8 real features ever touch HBM
            out_specs=pl.BlockSpec((tile_n, OUT_F), lambda i: (i, 0)),
        ),
        compiler_params=pltpu.CompilerParams(dimension_semantics=("parallel",)),
    )(x_flat, m_fused, b_fused)

    return out.reshape(batch, time_dim, OUT_F)


# ---------------------------------------------------------------------------
# Pure-JAX reference (direct convolutions, NCHW) for correctness check.
# ---------------------------------------------------------------------------
def ref_forward(x, ws, bs):
    batch, time_dim = x.shape[0], x.shape[1]
    h = x.reshape(-1, 1, 10, 10).astype(jnp.float32)
    for (cin, cout, s, p), W, Bv in zip(CONV_CFG, ws, bs):
        h = jax.lax.conv_general_dilated(
            h, W, window_strides=(s, s), padding=[(p, p), (p, p)],
            dimension_numbers=("NCHW", "OIHW", "NCHW"),
            precision=jax.lax.Precision.HIGHEST)
        h = h + Bv[None, :, None, None]
    return h.reshape(batch, time_dim, CHANS[-1])


if __name__ == "__main__":
    key = jax.random.PRNGKey(0)
    kp, kx = jax.random.split(key)
    ws, bs = build_params(kp)
    m_fused, b_fused = build_fused_operator(ws, bs)

    # input: (batch=2, time=8, 10, 10) -> GridConv reshapes to (-1, 1, 10, 10)
    x = jax.random.normal(kx, (2, 8, 10, 10), jnp.float32)

    out = gridconv_forward(x, m_fused, b_fused)
    out = jax.block_until_ready(out)

    ref = ref_forward(x, ws, bs)
    np.testing.assert_allclose(np.asarray(out), np.asarray(ref), rtol=1e-4, atol=1e-4)
    assert out.shape == (2, 8, CHANS[-1])
    print("KERNEL_OK")
</pallas_src>

<mosaic_0001>
module attributes {stable_mosaic.version = 11 : i64} {
  func.func @gridconv_kernel(%arg0: i32, %arg1: memref<8x100xf32, #tpu.memory_space<vmem>>, %arg2: memref<100x8xf32, #tpu.memory_space<vmem>>, %arg3: memref<1x8xf32, #tpu.memory_space<vmem>>, %arg4: memref<8x8xf32, #tpu.memory_space<vmem>>) attributes {dimension_semantics = [#tpu.dimension_semantics<parallel>], iteration_bounds = array<i64: 2>, scalar_prefetch = 0 : i64, scratch_operands = 0 : i64, tpu.core_type = #tpu.core_type<tc>, window_params = [{transform_indices = @transform_0, window_bounds = array<i64: 8, 100>}, {pipeline_mode = #tpu.pipeline_mode<synchronous>, transform_indices = @transform_1, window_bounds = array<i64: 100, 8>}, {pipeline_mode = #tpu.pipeline_mode<synchronous>, transform_indices = @transform_2, window_bounds = array<i64: 1, 8>}, {transform_indices = @transform_3, window_bounds = array<i64: 8, 8>}]} {
    %c0 = arith.constant 0 : index
    %c0_0 = arith.constant 0 : index
    %0 = vector.load %arg1[%c0, %c0_0] : memref<8x100xf32, #tpu.memory_space<vmem>>, vector<8x100xf32>
    %c0_1 = arith.constant 0 : index
    %c0_2 = arith.constant 0 : index
    %1 = vector.load %arg2[%c0_1, %c0_2] : memref<100x8xf32, #tpu.memory_space<vmem>>, vector<100x8xf32>
    %cst = arith.constant dense<0.000000e+00> : vector<8x8xf32>
    %2 = tpu.matmul %0, %1, %cst {dimension_numbers = #tpu.dot_dimension_numbers<[1], [0], [0], [1], [0, 0, 1, 1], [], []>, precision = #tpu.contract_precision<fp32>} : vector<8x100xf32>, vector<100x8xf32>, vector<8x8xf32> -> vector<8x8xf32>
    %c0_3 = arith.constant 0 : index
    %c0_4 = arith.constant 0 : index
    %3 = vector.load %arg3[%c0_3, %c0_4] : memref<1x8xf32, #tpu.memory_space<vmem>>, vector<1x8xf32>
    %4 = vector.broadcast %3 : vector<1x8xf32> to vector<8x8xf32>
    %5 = arith.addf %2, %4 : vector<8x8xf32>
    %c0_5 = arith.constant 0 : index
    %c0_6 = arith.constant 0 : index
    %6 = vector.load %arg4[%c0_5, %c0_6] : memref<8x8xf32, #tpu.memory_space<vmem>>, vector<8x8xf32>
    tpu.vector_store %arg4[%c0_5, %c0_6], %5 {strides = array<i32>} : memref<8x8xf32, #tpu.memory_space<vmem>>, vector<8x8xf32>,
    return
  }
  func.func @transform_0(%arg0: i32) -> (i32, i32) {
    %c0_i32 = arith.constant 0 : i32
    %c0_i32_0 = arith.constant 0 : i32
    return %arg0, %c0_i32 : i32, i32
  }
  func.func @transform_1(%arg0: i32) -> (i32, i32) {
    %c0_i32 = arith.constant 0 : i32
    %c0_i32_0 = arith.constant 0 : i32
    %c0_i32_1 = arith.constant 0 : i32
    return %c0_i32, %c0_i32_0 : i32, i32
  }
  func.func @transform_2(%arg0: i32) -> (i32, i32) {
    %c0_i32 = arith.constant 0 : i32
    %c0_i32_0 = arith.constant 0 : i32
    %c0_i32_1 = arith.constant 0 : i32
    return %c0_i32, %c0_i32_0 : i32, i32
  }
  func.func @transform_3(%arg0: i32) -> (i32, i32) {
    %c0_i32 = arith.constant 0 : i32
    %c0_i32_0 = arith.constant 0 : i32
    return %arg0, %c0_i32 : i32, i32
  }
}

</mosaic_0001>

<bundles_post_ra>
// kernel: tpu_custom_call.1
= control target key start
LH: loop header
LB: loop body
LE: loop exit
PB: predicated region body
PF: predicated region fallthrough
CT: control target
= control target key end

     0   :  { %s1280_s12 = smov 0   ;;  %s1516_s0 = inlined_call_operand.vmem [shape: f32[16,100], index: 0, kind: input, shape index: {}]   ;;  %s1517_s1 = inlined_call_operand.vmem [shape: f32[100,8], index: 1, kind: input, shape index: {}]   ;;  %s1518_s2 = inlined_call_operand.vmem [shape: f32[1,8], index: 2, kind: input, shape index: {}]   ;;  %s1519_s3 = inlined_call_operand.vmem [shape: f32[16,8], index: 3, kind: output, shape index: {}]  }
   0x1 LB: > { %s852_s13 = sadd.s32 4294967295, %s1255_s12   ;;  %p856_p0 = scmp.ge.s32.totalorder %s1255_s12, 1  ;;  %s1255_s12 = sphi %s1280_s12, %s13_s12  }
   0x2   : > { %p136_p1 = scmp.lt.s32.totalorder %s1255_s12, 3 }
   0x4   : > { %p137_p2 = pnand %p856_p0, %p136_p1 }
   0x5   : > { %v167_v0 = vld [vmem:[%s1517_s1] sm:$0xff] (!%p137_p2)  ;;  %v168_v1 = vld [vmem:[%s1517_s1 + $0x8] sm:$0xff] (!%p137_p2)  ;;  %v169_v2 = vld [vmem:[%s1517_s1 + $0x10] sm:$0xff] (!%p137_p2)  ;;  %v1257_v3 = vmov (!%p137_p2), 0.0|0.0   ;;  %p158_p3 = scmp.lt.s32.totalorder (!%p137_p2), %s852_s13, 1  ;;  %vm187_vm0 = vcmask (!%p137_p2), 818176  }
   0x6   : > { %140 = sbr.rel (%p137_p2) target bundleno = 306 (0x132), region = 32  ;;  %1120 = vmatprep.subr.bf16.mxu1 (!%p137_p2), %v1257_v3  ;;  %1174 = vmatprep.subr.bf16.mxu0 (!%p137_p2), %v1257_v3  ;;  %v196_v4 = vand.u32 (!%p137_p2), 4294901760, %v167_v0  ;;  %v199_v5 = vand.u32 (!%p137_p2), 4294901760, %v168_v1  ;;  %v170_v6 = vld [vmem:[%s1517_s1 + $0x18] sm:$0xff] (!%p137_p2)  ;;  %v202_v7 = vand.u32 (!%p137_p2), 4294901760, %v169_v2  ;;  %v171_v8 = vld [vmem:[%s1517_s1 + $0x20] sm:$0xff] (!%p137_p2) }
   0x7   : > { %v172_v9 = vld [vmem:[%s1517_s1 + $0x28] sm:$0xff] (!%p137_p2)  ;;  %v205_v10 = vand.u32 (!%p137_p2), 4294901760, %v170_v6  ;;  %v208_v12 = vand.u32 (!%p137_p2), 4294901760, %v171_v8  ;;  %v173_v15 = vld [vmem:[%s1517_s1 + $0x30] sm:$0xff] (!%p137_p2)  ;;  %v1324_v16 = vld [vmem:[%s1517_s1 + $0x38] sm:$0xff] (!%p137_p2)  ;;  %vm1258_vm1 = vmmov (!%p137_p2), 0  }
   0x8   : > { %v1308_v11 = vpack.c.bf16 (!%p137_p2), %v199_v5, %v196_v4  ;;  %v211_v13 = vand.u32 (!%p137_p2), 4294901760, %v172_v9  ;;  %v214_v18 = vand.u32 (!%p137_p2), 4294901760, %v173_v15  ;;  %v217_v19 = vand.u32 (!%p137_p2), 4294901760, %v1324_v16  ;;  %v175_v21 = vld [vmem:[%s1517_s1 + $0x40] sm:$0xff] (!%p137_p2)  ;;  %v176_v22 = vld [vmem:[%s1517_s1 + $0x48] sm:$0xff] (!%p137_p2)  ;;  %v177_v31 = vld [vmem:[%s1517_s1 + $0x50] sm:$0xff] (!%p137_p2) }
   0x9   : > { %v1312_v14 = vpack.c.bf16 (!%p137_p2), %v205_v10, %v202_v7  ;;  %v1259_v24 = vmov (!%p137_p2), 0.0   ;;  %v1351_v26 = vsub.f32 (!%p137_p2), %v167_v0, %v196_v4  ;;  %v1353_v27 = vsub.f32 (!%p137_p2), %v168_v1, %v199_v5  ;;  %v178_v32 = vld [vmem:[%s1517_s1 + $0x58] sm:$0xff] (!%p137_p2)  ;;  %v179_v43 = vld [vmem:[%s1517_s1 + $0x60] sm:$0xf] (!%p137_p2) }
   0xa   : > { %1122 = vmatpush3.bf16.msra.mxu1 (!%p137_p2), %v1308_v11  ;;  %1176 = vmatpush3.bf16.msra.mxu0 (!%p137_p2), %v1308_v11  ;;  %v1327_v17 = vpack.c.bf16 (!%p137_p2), %v211_v13, %v208_v12  ;;  %v1357_v28 = vpack.c.bf16 (!%p137_p2), %v217_v19, %v214_v18  ;;  %v220_v29 = vand.u32 (!%p137_p2), 4294901760, %v175_v21  ;;  %v223_v30 = vand.u32 (!%p137_p2), 4294901760, %v176_v22 }
   0xb   : > { %1123 = vmatprep.subr.bf16.mxu1 (!%p137_p2), %v1257_v3  ;;  %1177 = vmatprep.subr.bf16.mxu0 (!%p137_p2), %v1257_v3  ;;  %v1367_v33 = vsub.f32 (!%p137_p2), %v169_v2, %v202_v7  ;;  %v1372_v35 = vsub.f32 (!%p137_p2), %v170_v6, %v205_v10  ;;  %v286_v36 = vand.u32 (!%p137_p2), 4294901760, %v1351_v26  ;;  %v293_v37 = vand.u32 (!%p137_p2), 4294901760, %v1353_v27 }
   0xc   : > { %972 = vmatprep.mubr.msk.f32.mxu1 (!%p137_p2), %vm1258_vm1, %v1259_v24  ;;  %1059 = vmatprep.mubr.msk.f32.mxu0 (!%p137_p2), %vm1258_vm1, %v1259_v24  ;;  %v1378_v38 = vpack.c.bf16 (!%p137_p2), %v223_v30, %v220_v29  ;;  %v226_v39 = vand.u32 (!%p137_p2), 4294901760, %v177_v31  ;;  %v229_v40 = vand.u32 (!%p137_p2), 4294901760, %v178_v32  ;;  %vm191_vm2 = vcmask (!%p137_p2), 1043456  }
   0xd   : > { %s1521_s13 = smov (!%p158_p3, %s852_s13), 1  ;;  %v1382_v41 = vsub.f32 %v171_v8, %v208_v12  ;;  %v1384_v42 = vsub.f32 %v172_v9, %v211_v13  ;;  %v300_v45 = vand.u32 4294901760, %v1367_v33  ;;  %v287_v46 = vsub.f32 %v1351_v26, %v286_v36 }
   0xe   : > { %s857_s30 = sshll.u32 %s1521_s13, 3  ;;  %1125 = vmatpush3.bf16.msra.mxu1 %v1312_v14  ;;  %1179 = vmatpush3.bf16.msra.mxu0 %v1312_v14  ;;  %v294_v47 = vsub.f32 %v1353_v27, %v293_v37  ;;  %v307_v48 = vand.u32 4294901760, %v1372_v35  ;;  %v1396_v49 = vpack.c.bf16 %v229_v40, %v226_v39  ;;  %v1398_v50 = vsub.f32 %v173_v15, %v214_v18 }
   0xf   : > { %s161_s6 = scalar_lea.vmem %s1516_s0, %s857_s30  ;;  %1126 = vmatprep.subr.bf16.mxu1 %v1257_v3  ;;  %1180 = vmatprep.subr.bf16.mxu0 %v1257_v3  ;;  %v193_v51 = vsel %vm191_vm2, %v179_v43, 0  ;;  %v301_v53 = vsub.f32 %v1367_v33, %v300_v45  ;;  %v314_v54 = vand.u32 4294901760, %v1382_v41  ;;  %v321_v55 = vand.u32 4294901760, %v1384_v42  ;;  %s165_s23 = scalar_lea.vmem %s1519_s3, %s857_s30 }
  0x10   : > { %v166_v20 = vld [vmem:[%s161_s6] sm:$0xff]  ;;  %v1407_v56 = vsub.f32 %v1324_v16, %v217_v19  ;;  %v288_v57 = vand.u32 4294901760, %v287_v46  ;;  %v295_v58 = vand.u32 4294901760, %v294_v47  ;;  %v308_v59 = vsub.f32 %v1372_v35, %v307_v48 }
  0x11   : > { %v189_v23 = vsel %vm187_vm0, %v166_v20, 0  ;;  %v1412_v60 = vand.u32 4294901760, %v193_v51  ;;  %v1414_v61 = vsub.f32 %v175_v21, %v220_v29  ;;  %v1416_v62 = vsub.f32 %v176_v22, %v223_v30 }
  0x12   : > { %v1349_v25 = vand.u32 4294901760, %v189_v23  ;;  %1128 = vmatpush3.bf16.msra.mxu1 %v1327_v17  ;;  %1182 = vmatpush3.bf16.msra.mxu0 %v1327_v17  ;;  %v1193_v63 = vpack.c.bf16 %v293_v37, %v286_v36  ;;  %v302_v1 = vand.u32 4294901760, %v301_v53  ;;  %v315_v2 = vsub.f32 %v1382_v41, %v314_v54 }
  0x13   : > { %1129 = vmatprep.subr.bf16.mxu1 %v1257_v3  ;;  %1183 = vmatprep.subr.bf16.mxu0 %v1257_v3  ;;  %v322_v4 = vsub.f32 %v1384_v42, %v321_v55  ;;  %v1139_v5 = vpack.c.bf16 %v295_v58, %v288_v57  ;;  %v309_v6 = vand.u32 4294901760, %v308_v59  ;;  %v328_v7 = vand.u32 4294901760, %v1398_v50 }
  0x14   : > { %v1370_v34 = vsub.f32 %v189_v23, %v1349_v25  ;;  %v335_v8 = vand.u32 4294901760, %v1407_v56  ;;  %v1426_v9 = vsub.f32 %v177_v31, %v226_v39  ;;  %v1428_v10 = vsub.f32 %v178_v32, %v229_v40 }
  0x15   : > { %v1196_v12 = vpack.c.bf16 %v307_v48, %v300_v45  ;;  %v316_v13 = vand.u32 4294901760, %v315_v2  ;;  %v323_v15 = vand.u32 4294901760, %v322_v4  ;;  %v342_v16 = vand.u32 4294901760, %v1414_v61 }
  0x16   : > { %1131 = vmatpush3.bf16.msra.mxu1 %v1357_v28  ;;  %1185 = vmatpush3.bf16.msra.mxu0 %v1357_v28  ;;  %v275_v44 = vand.u32 4294901760, %v1370_v34  ;;  %v1142_v18 = vpack.c.bf16 %v309_v6, %v302_v1  ;;  %v329_v19 = vsub.f32 %v1398_v50, %v328_v7  ;;  %v336_v20 = vsub.f32 %v1407_v56, %v335_v8 }
  0x17   : > { %1132 = vmatprep.subr.bf16.mxu1 %v1257_v3  ;;  %1186 = vmatprep.subr.bf16.mxu0 %v1257_v3  ;;  %v349_v21 = vand.u32 4294901760, %v1416_v62  ;;  %v1145_v22 = vpack.c.bf16 %v323_v15, %v316_v13  ;;  %v1199_v23 = vpack.c.bf16 %v321_v55, %v314_v54  ;;  %v343_v29 = vsub.f32 %v1414_v61, %v342_v16 }
  0x18   : > { %v276_v52 = vsub.f32 %v1370_v34, %v275_v44  ;;  %v356_v30 = vand.u32 4294901760, %v1426_v9  ;;  %v330_v31 = vand.u32 4294901760, %v329_v19  ;;  %v337_v32 = vand.u32 4294901760, %v336_v20 }
  0x19   : > { %v350_v36 = vsub.f32 %v1416_v62, %v349_v21  ;;  %v363_v37 = vand.u32 4294901760, %v1428_v10  ;;  %v1449_v39 = vsub.f32 %v193_v51, %v1412_v60  ;;  %v1202_v40 = vpack.c.bf16 %v335_v8, %v328_v7 }
  0x1a   : > { %1134 = vmatpush3.bf16.msra.mxu1 %v1378_v38  ;;  %1188 = vmatpush3.bf16.msra.mxu0 %v1378_v38  ;;  %v277_v0 = vand.u32 4294901760, %v276_v52  ;;  %v344_v43 = vand.u32 4294901760, %v343_v29  ;;  %v357_v46 = vsub.f32 %v1426_v9, %v356_v30  ;;  %v1205_v48 = vpack.c.bf16 %v349_v21, %v342_v16 }
  0x1b   : > { %1135 = vmatprep.subr.bf16.mxu1 %v1257_v3  ;;  %1189 = vmatprep.subr.bf16.mxu0 %v1257_v3  ;;  %v351_v45 = vand.u32 4294901760, %v350_v36  ;;  %v364_v47 = vsub.f32 %v1428_v10, %v363_v37  ;;  %v370_v54 = vand.u32 4294901760, %v1449_v39  ;;  %v1208_v57 = vpack.c.bf16 %v363_v37, %v356_v30 }
  0x1c   : > { %v358_v51 = vand.u32 4294901760, %v357_v46  ;;  %vm797_vm3 = vcmask 64512  }
  0x1d   : > { %v1151_v52 = vpack.c.bf16 %v351_v45, %v344_v43  ;;  %v365_v53 = vand.u32 4294901760, %v364_v47  ;;  %v371_v58 = vsub.f32 %v1449_v39, %v370_v54 }
  0x1e   : > { %1137 = vmatpush3.bf16.msra.mxu1 %v1396_v49  ;;  %1191 = vmatpush3.bf16.msra.mxu0 %v1396_v49 }
  0x1f   : > { %970 = vmatprep.subr.mxu1 %v1259_v24  ;;  %1057 = vmatprep.subr.mxu0 %v1259_v24  ;;  %v1154_v55 = vpack.c.bf16 %v365_v53, %v358_v51  ;;  %v372_v59 = vand.u32 4294901760, %v371_v58 }
  0x22   : > { %971 = vmatpush3.msra.mxu1 %v1412_v60  ;;  %1058 = vmatpush3.msra.mxu0 %v1412_v60 }
  0x23   : > { %1138 = vmatprep.subr.bf16.mxu1 %v1257_v3  ;;  %1192 = vmatprep.subr.bf16.mxu0 %v1257_v3 }
  0x24   : > { %973 = vmatmul.mubr.f32.vlgmr.msra.gmra.mrb[0].mxu1 %v277_v0  ;;  %1060 = vmatmul.mubr.f32.vlgmr.msra.gmra.mrb[0].mxu0 %v275_v44  ;;  %v1148_v44 = vpack.c.bf16 %v337_v32, %v330_v31  ;;  %v1160_v0 = vpack.c.bf16 %v1372_v35, %v1367_v33 }
  0x25   : > { %1140 = vmatpush3.bf16.msra.mxu1 %v1139_v5  ;;  %1194 = vmatpush3.bf16.msra.mxu0 %v1193_v63  ;;  %v1157_v63 = vpack.c.bf16 %v1353_v27, %v1351_v26  ;;  %v1163_v26 = vpack.c.bf16 %v1384_v42, %v1382_v41  ;;  %v859_v27 = vld [vmem:[%s1518_s2] ss:$0 sm:$0xff] }
  0x26   : > { %1141 = vmatprep.subr.bf16.mxu1 %v1257_v3  ;;  %1195 = vmatprep.subr.bf16.mxu0 %v1257_v3 }
  0x27   : > { %1001 = vmatprep.mubr.msk.f32.mxu1 %vm1258_vm1, %v1259_v24  ;;  %1088 = vmatprep.mubr.msk.f32.mxu0 %vm1258_vm1, %v1259_v24 }
  0x29   : > { %1143 = vmatpush3.bf16.msra.mxu1 %v1142_v18  ;;  %1197 = vmatpush3.bf16.msra.mxu0 %v1196_v12 }
  0x2a   : > { %1144 = vmatprep.subr.bf16.mxu1 %v1257_v3  ;;  %1198 = vmatprep.subr.bf16.mxu0 %v1257_v3 }
  0x2d   : > { %1146 = vmatpush3.bf16.msra.mxu1 %v1145_v22  ;;  %1200 = vmatpush3.bf16.msra.mxu0 %v1199_v23 }
  0x2e   : > { %1147 = vmatprep.subr.bf16.mxu1 %v1257_v3  ;;  %1201 = vmatprep.subr.bf16.mxu0 %v1257_v3 }
  0x31   : > { %1149 = vmatpush3.bf16.msra.mxu1 %v1148_v44  ;;  %1203 = vmatpush3.bf16.msra.mxu0 %v1202_v40 }
  0x32   : > { %1150 = vmatprep.subr.bf16.mxu1 %v1257_v3  ;;  %1204 = vmatprep.subr.bf16.mxu0 %v1257_v3 }
  0x35   : > { %1152 = vmatpush3.bf16.msra.mxu1 %v1151_v52  ;;  %1206 = vmatpush3.bf16.msra.mxu0 %v1205_v48 }
  0x36   : > { %1153 = vmatprep.subr.bf16.mxu1 %v1257_v3  ;;  %1207 = vmatprep.subr.bf16.mxu0 %v1257_v3 }
  0x39   : > { %1155 = vmatpush3.bf16.msra.mxu1 %v1154_v55  ;;  %1209 = vmatpush3.bf16.msra.mxu0 %v1208_v57 }
  0x3a   : > { %999 = vmatprep.subr.mxu1 %v1259_v24  ;;  %1086 = vmatprep.subr.mxu0 %v1259_v24 }
  0x3d   : > { %1000 = vmatpush3.msra.mxu1 %v372_v59  ;;  %1087 = vmatpush3.msra.mxu0 %v370_v54 }
  0x3e   : > { %1156 = vmatprep.subr.bf16.mxu1 %v1257_v3  ;;  %1210 = vmatprep.subr.bf16.mxu0 %v1257_v3 }
  0x3f   : > { %1002 = vmatmul.mubr.f32.vlgmr.msra.gmra.mrb[0].mxu1 %v1349_v25  ;;  %1089 = vmatmul.mubr.f32.vlgmr.msra.gmra.mrb[0].mxu0 %v1349_v25 }
  0x40   : > { %1158 = vmatpush3.bf16.msra.mxu1 %v1157_v63  ;;  %1212 = vmatpush3.bf16.msra.mxu0 %v1308_v11  ;;  %v1166_v11 = vpack.c.bf16 %v1407_v56, %v1398_v50 }
  0x41   : > { %1159 = vmatprep.subr.bf16.mxu1 %v1257_v3  ;;  %1213 = vmatprep.subr.bf16.mxu0 %v1257_v3 }
  0x42   : > { %1030 = vmatprep.mubr.msk.f32.mxu1 %vm1258_vm1, %v1259_v24  ;;  %1117 = vmatprep.mubr.msk.f32.mxu0 %vm1258_vm1, %v1259_v24 }
  0x44   : > { %1161 = vmatpush3.bf16.msra.mxu1 %v1160_v0  ;;  %1215 = vmatpush3.bf16.msra.mxu0 %v1312_v14  ;;  %v1169_v14 = vpack.c.bf16 %v1416_v62, %v1414_v61 }
  0x45   : > { %1162 = vmatprep.subr.bf16.mxu1 %v1257_v3  ;;  %1216 = vmatprep.subr.bf16.mxu0 %v1257_v3 }
  0x48   : > { %1164 = vmatpush3.bf16.msra.mxu1 %v1163_v26  ;;  %1218 = vmatpush3.bf16.msra.mxu0 %v1327_v17  ;;  %v1172_v17 = vpack.c.bf16 %v1428_v10, %v1426_v9 }
  0x49   : > { %1165 = vmatprep.subr.bf16.mxu1 %v1257_v3  ;;  %1219 = vmatprep.subr.bf16.mxu0 %v1257_v3 }
  0x4c   : > { %1167 = vmatpush3.bf16.msra.mxu1 %v1166_v11  ;;  %1221 = vmatpush3.bf16.msra.mxu0 %v1357_v28 }
  0x4d   : > { %1168 = vmatprep.subr.bf16.mxu1 %v1257_v3  ;;  %1222 = vmatprep.subr.bf16.mxu0 %v1257_v3 }
  0x50   : > { %1170 = vmatpush3.bf16.msra.mxu1 %v1169_v14  ;;  %1224 = vmatpush3.bf16.msra.mxu0 %v1378_v38 }
  0x51   : > { %1171 = vmatprep.subr.bf16.mxu1 %v1257_v3  ;;  %1225 = vmatprep.subr.bf16.mxu0 %v1257_v3 }
  0x54   : > { %1173 = vmatpush3.bf16.msra.mxu1 %v1172_v17  ;;  %1227 = vmatpush3.bf16.msra.mxu0 %v1396_v49 }
  0x55   : > { %1028 = vmatprep.subr.mxu1 %v1259_v24  ;;  %1115 = vmatprep.subr.mxu0 %v1259_v24 }
  0x58   : > { %1029 = vmatpush3.msra.mxu1 %v1449_v39  ;;  %1116 = vmatpush3.msra.mxu0 %v1412_v60 }
  0x59   : > { %1031 = vmatmul.mubr.f32.vlgmr.msra.gmra.mrb[0].mxu1 %v1370_v34  ;;  %1118 = vmatmul.mubr.f32.vlgmr.msra.gmra.mrb[0].mxu0 %v1349_v25 }
 0x12c   : > { %v513_v3 = vpop.f32.mrb[0].mxu1  ;;  %v793_v28 = vpop.f32.mrb[0].mxu0 }
 0x12d   : > { %v1228_v33 = vadd.f32 %v859_v27, %v513_v3  ;;  %v1032_v35 = vpop.f32.mrb[1].mxu1  ;;  %v1119_v38 = vpop.f32.mrb[1].mxu0 }
 0x12f   : > { %v1229_v24 = vadd.f32 %v1228_v33, %v793_v28 }
 0x131   : > { %798 = vst.msk [vmem:[%s165_s23] sm:$0xff] %vm797_vm3, %v1229_v24 }
 0x132 PF: > { %s13_s12 = sadd.s32 1, %s1255_s12  }
 0x133   : > { %p10_p4 = scmp.ge.s32.totalorder %s13_s12, 4  }
 0x135   :  { %12 = sbr.rel (!%p10_p4) target bundleno = 1 (0x1), region = 62 }

</bundles_post_ra>
